<compile_context>
chip_gen: v6e
topology: v6e:2x2x1
jax: 0.10.0
libtpu: 0.0.40
codegen_flags: <defaults>
</compile_context>

<pallas_src>
import functools

import jax
import jax.numpy as jnp
import numpy as np
from jax.experimental import pallas as pl
from jax.experimental.pallas import tpu as pltpu

_LANES = 128
# Code budget: max number of (8,128) vreg slices processed per (statically
# unrolled) accumulate branch.  Keeps the kernel body compact while allowing
# ~2 MiB (f32) / ~1 MiB (bf16) input blocks.
_MAX_VREG_SLICES = 512


def _round_up(x, m):
    return ((x + m - 1) // m) * m


def _hw_params():
    """Per-generation tiling/VMEM parameters (defensive: falls back to v6e)."""
    vmem_cap = 128 << 20
    try:
        vmem_cap = int(pltpu.get_tpu_info().vmem_capacity_bytes)
    except Exception:
        pass
    kind = ""
    try:
        kind = jax.devices()[0].device_kind.lower()
    except Exception:
        pass
    if vmem_cap <= (64 << 20) or "v7" in kind:
        # v7x-like: 64 MiB VMEM / TC, ~3.2 TB/s HBM, 2 TensorCores per chip.
        return dict(target_block_bytes=4 << 20,
                    vmem_limit_bytes=44 << 20,
                    split_rows_for_cores=True)
    if "v5" in kind:
        # v5e: 820 GB/s HBM; ~2 MiB blocks already amortize the step overhead.
        return dict(target_block_bytes=2 << 20,
                    vmem_limit_bytes=32 << 20,
                    split_rows_for_cores=False)
    # v6e (default): 128 MiB physical VMEM, ~1.4 TB/s HBM, single TC.
    return dict(target_block_bytes=4 << 20,
                vmem_limit_bytes=64 << 20,
                split_rows_for_cores=False)


def _loss_kernel(est_ref, src_ref, out_ref, acc_ref, *,
                 loss_n, n_total, tn, mask_tail, last_block_start):
    """Grid: (row blocks [parallel], reduction chunks [arbitrary, last])."""
    k = pl.program_id(1)
    last_k = pl.num_programs(1) - 1
    rt = acc_ref.shape[0]
    n_slices = tn // _LANES

    @pl.when(k == 0)
    def _():
        acc_ref[...] = jnp.zeros_like(acc_ref)

    def slice_err(lo, block_start):
        """Error for one static 128-lane slice, computed straight off the refs
        (no full-block f32 temporary -> a handful of live vregs)."""
        if block_start is not None and block_start + lo >= n_total:
            # Slice is entirely past the valid reduction length (static).
            return jnp.zeros((rt, _LANES), jnp.float32)
        d = (est_ref[:, lo:lo + _LANES].astype(jnp.float32)
             - src_ref[:, lo:lo + _LANES].astype(jnp.float32))
        err = jnp.abs(d) if loss_n == "l1" else d * d
        if block_start is not None:
            lo_abs = block_start + lo
            if lo_abs + _LANES > n_total:  # static: slice crosses the edge
                col = jax.lax.broadcasted_iota(jnp.int32, err.shape, 1)
                err = jnp.where(col < (n_total - lo_abs), err, 0.0)
        return err

    def accumulate(block_start):
        # 4 interleaved partial sums keep the serial add chain ~n_slices/4.
        n_par = min(4, n_slices)
        parts = [None] * n_par
        for s in range(n_slices):
            e = slice_err(s * _LANES, block_start)
            j = s % n_par
            parts[j] = e if parts[j] is None else parts[j] + e
        tot = parts[0]
        for p in parts[1:]:
            tot = tot + p
        acc_ref[...] += tot

    if mask_tail:
        # Tail mask only on the last reduction step; interior steps stay clean.
        @pl.when(k != last_k)
        def _():
            accumulate(None)

        @pl.when(k == last_k)
        def _():
            accumulate(last_block_start)
    else:
        accumulate(None)

    @pl.when(k == last_k)
    def _():
        # Single cross-lane (XLU) reduce per output tile, then scale (+sqrt).
        total = jnp.sum(acc_ref[...], axis=-1, keepdims=True)
        mean = total * (1.0 / n_total)
        if loss_n == "mse":
            mean = jnp.sqrt(mean)
        out_ref[...] = mean


def _ref_per_bs(estimate, sources, loss_n):
    """Plain-JAX per-(batch, source) loss, f32 math (matches kernel)."""
    diff = estimate.astype(jnp.float32) - sources.astype(jnp.float32)
    dims = tuple(range(2, sources.ndim))
    if loss_n == "l1":
        return jnp.mean(jnp.abs(diff), axis=dims)
    return jnp.sqrt(jnp.mean(diff * diff, axis=dims))


def get_loss(estimate, sources, *, loss_n="l1", quantizer=None, diffq=0.0,
             tn=None, row_tile=256, force_pallas=False,
             min_pallas_elems=1 << 16):
    """Pallas-backed equivalent of GetLoss.forward(estimate, sources)."""
    assert estimate.shape == sources.shape
    if loss_n not in ("l1", "mse"):
        raise ValueError(f"Invalid loss {loss_n}")

    B, S = sources.shape[0], sources.shape[1]
    n_total = 1
    for d in sources.shape[2:]:
        n_total *= d
    rows = B * S
    total_elems = rows * n_total

    if (not force_pallas) and total_elems < min_pallas_elems:
        # Tiny problem: per-grid-step + launch overhead would dominate.
        per_bs = _ref_per_bs(estimate, sources, loss_n)
    else:
        hw = _hw_params()

        # Native-dtype DMA; no wrapper f32 cast (kernel upcasts on the VPU).
        est2 = estimate.reshape(rows, n_total)
        src2 = sources.reshape(rows, n_total)

        if n_total < 128:
            # Pad reduction axis to one lane tile; zero diffs contribute 0.
            pad = 128 - n_total
            est2 = jnp.pad(est2, ((0, 0), (0, pad)))
            src2 = jnp.pad(src2, ((0, 0), (0, pad)))
        n_cols = est2.shape[1]
        n_cols_pad = _round_up(n_cols, _LANES)

        # ---- row tiling (parallel grid axis) ----
        if hw["split_rows_for_cores"] and rows >= 16:
            # Ensure grid_r >= 2 so both v7x TensorCores get work.
            rt = min(rows, _round_up(pl.cdiv(rows, 2), 8))
        elif rows <= row_tile:
            rt = rows
        else:
            rt = row_tile if row_tile % 8 == 0 else rows
        grid_r = pl.cdiv(rows, rt)

        # ---- reduction tiling (arbitrary grid axis, last) ----
        itemsize = jnp.dtype(est2.dtype).itemsize
        vmem_limit = int(hw["vmem_limit_bytes"])
        # Pipeline footprint: 2 inputs x 2 buffers must fit with headroom.
        max_blk_bytes = max(rt * _LANES * itemsize,
                            (vmem_limit - (4 << 20)) // 4)
        blk_bytes = min(hw["target_block_bytes"], max_blk_bytes)
        tn_bytes = blk_bytes // (rt * itemsize)
        tn_code = (_MAX_VREG_SLICES // ((rt + 7) // 8)) * _LANES
        tn_eff = min(tn_bytes, tn_code, n_cols_pad)
        if tn is not None:
            tn_eff = min(tn_eff, tn)
        tn_eff = max(_LANES, (tn_eff // _LANES) * _LANES)

        grid_k = pl.cdiv(n_cols_pad, tn_eff)
        mask_tail = (grid_k * tn_eff) > n_cols
        last_block_start = (grid_k - 1) * tn_eff

        kernel = functools.partial(
            _loss_kernel, loss_n=loss_n, n_total=n_total, tn=tn_eff,
            mask_tail=mask_tail, last_block_start=last_block_start)

        cost = pl.CostEstimate(
            flops=3 * total_elems,
            transcendentals=rows if loss_n == "mse" else 0,
            bytes_accessed=2 * total_elems * itemsize + rows * 4,
        )

        per_bs = pl.pallas_call(
            kernel,
            out_shape=jax.ShapeDtypeStruct((rows, 1), jnp.float32),
            grid_spec=pltpu.PrefetchScalarGridSpec(
                num_scalar_prefetch=0,
                grid=(grid_r, grid_k),
                in_specs=[
                    pl.BlockSpec((rt, tn_eff), lambda i, k: (i, k)),
                    pl.BlockSpec((rt, tn_eff), lambda i, k: (i, k)),
                ],
                out_specs=pl.BlockSpec((rt, 1), lambda i, k: (i, 0)),
                scratch_shapes=[pltpu.VMEM((rt, _LANES), jnp.float32)],
            ),
            compiler_params=pltpu.CompilerParams(
                dimension_semantics=("parallel", "arbitrary"),
                vmem_limit_bytes=vmem_limit,
            ),
            cost_estimate=cost,
        )(est2, src2)

    per_bs = per_bs.reshape(B, S)
    loss = jnp.mean(per_bs, axis=0)  # .mean(0) over the batch dim

    ms = 0
    if quantizer is not None:
        ms = quantizer.model_size()  # TODO(synk): no quantizer in this synthetic setup
    if diffq:
        loss = loss + diffq * ms
    return loss, ms


def _ref_get_loss(estimate, sources, loss_n):
    return jnp.mean(_ref_per_bs(estimate, sources, loss_n), axis=0)


if __name__ == "__main__":
    key = jax.random.PRNGKey(0)
    ok = True

    def check(est, src, loss_n, tol=1e-5, **kw):
        loss, ms = get_loss(est, src, loss_n=loss_n, quantizer=None, diffq=0.0,
                            force_pallas=True, **kw)
        loss = jax.block_until_ready(loss)
        ref = _ref_get_loss(est, src, loss_n)
        good = bool(np.allclose(np.asarray(loss), np.asarray(ref),
                                rtol=tol, atol=tol))
        return good and loss.shape == (src.shape[1],) and ms == 0

    # small demucs-like shapes: (batch=2, sources=4, channels=2, time=256)
    k1, k2 = jax.random.split(key)
    est = jax.random.normal(k1, (2, 4, 2, 256), dtype=jnp.float32)
    src = jax.random.normal(k2, (2, 4, 2, 256), dtype=jnp.float32)
    for loss_n in ("l1", "mse"):
        ok &= check(est, src, loss_n)

    # non-divisible reduction length (T=300 -> n_total=600) exercises tail mask
    k3, k4 = jax.random.split(k2)
    est_t = jax.random.normal(k3, (2, 4, 2, 300), dtype=jnp.float32)
    src_t = jax.random.normal(k4, (2, 4, 2, 300), dtype=jnp.float32)
    for loss_n in ("l1", "mse"):
        ok &= check(est_t, src_t, loss_n)
        # force multiple reduction steps (accumulation across k + masked tail)
        ok &= check(est_t, src_t, loss_n, tn=256)

    # native bf16 inputs: no wrapper f32 cast, kernel upcasts on the VPU
    k5, k6 = jax.random.split(k4)
    est_b = jax.random.normal(k5, (4, 4, 2, 256), dtype=jnp.float32).astype(jnp.bfloat16)
    src_b = jax.random.normal(k6, (4, 4, 2, 256), dtype=jnp.float32).astype(jnp.bfloat16)
    for loss_n in ("l1", "mse"):
        ok &= check(est_b, src_b, loss_n)

    # ragged row blocks: rows=12 with rt=8 -> masked output rows in last block
    k7, k8 = jax.random.split(k6)
    est_r = jax.random.normal(k7, (3, 4, 2, 256), dtype=jnp.float32)
    src_r = jax.random.normal(k8, (3, 4, 2, 256), dtype=jnp.float32)
    for loss_n in ("l1", "mse"):
        ok &= check(est_r, src_r, loss_n, row_tile=8)

    # tiny reduction (< 128 lanes) exercises the zero-pad path
    k9, k10 = jax.random.split(k8)
    est_s = jax.random.normal(k9, (2, 4, 30), dtype=jnp.float32)
    src_s = jax.random.normal(k10, (2, 4, 30), dtype=jnp.float32)
    for loss_n in ("l1", "mse"):
        ok &= check(est_s, src_s, loss_n)

    if ok:
        print("KERNEL_OK")
    else:
        print("KERNEL_MISMATCH")
</pallas_src>

<mosaic_0001>
module attributes {stable_mosaic.version = 11 : i64} {
  func.func @_loss_kernel(%arg0: i32, %arg1: i32, %arg2: memref<8x512xf32, #tpu.memory_space<vmem>>, %arg3: memref<8x512xf32, #tpu.memory_space<vmem>>, %arg4: memref<8x1xf32, #tpu.memory_space<vmem>>, %arg5: memref<8x128xf32, #tpu.memory_space<vmem>>) attributes {dimension_semantics = [#tpu.dimension_semantics<parallel>, #tpu.dimension_semantics<arbitrary>], iteration_bounds = array<i64: 1, 1>, scalar_prefetch = 0 : i64, scratch_operands = 1 : i64, tpu.core_type = #tpu.core_type<tc>, window_params = [{transform_indices = @transform_0, window_bounds = array<i64: 8, 512>}, {transform_indices = @transform_1, window_bounds = array<i64: 8, 512>}, {transform_indices = @transform_2, window_bounds = array<i64: 8, 1>}]} {
    %c0_i32 = arith.constant 0 : i32
    %0 = arith.cmpi eq, %arg1, %c0_i32 : i32
    %1 = arith.extui %0 : i1 to i32
    %c0_i32_0 = arith.constant 0 : i32
    %2 = arith.cmpi ne, %1, %c0_i32_0 : i32
    scf.if %2 {
      %cst = arith.constant 0.000000e+00 : f32
      %28 = vector.broadcast %cst : f32 to vector<8x128xf32>
      %c0_19 = arith.constant 0 : index
      %c0_20 = arith.constant 0 : index
      %29 = vector.load %arg5[%c0_19, %c0_20] : memref<8x128xf32, #tpu.memory_space<vmem>>, vector<8x128xf32>
      tpu.vector_store %arg5[%c0_19, %c0_20], %28 {strides = array<i32>} : memref<8x128xf32, #tpu.memory_space<vmem>>, vector<8x128xf32>,
    } else {
    }
    %c0 = arith.constant 0 : index
    %c0_1 = arith.constant 0 : index
    %3 = vector.load %arg2[%c0, %c0_1] : memref<8x512xf32, #tpu.memory_space<vmem>>, vector<8x128xf32>
    %c0_2 = arith.constant 0 : index
    %c0_3 = arith.constant 0 : index
    %4 = vector.load %arg3[%c0_2, %c0_3] : memref<8x512xf32, #tpu.memory_space<vmem>>, vector<8x128xf32>
    %5 = arith.subf %3, %4 : vector<8x128xf32>
    %6 = math.absf %5 : vector<8x128xf32>
    %c0_4 = arith.constant 0 : index
    %c128 = arith.constant 128 : index
    %7 = vector.load %arg2[%c0_4, %c128] : memref<8x512xf32, #tpu.memory_space<vmem>>, vector<8x128xf32>
    %c0_5 = arith.constant 0 : index
    %c128_6 = arith.constant 128 : index
    %8 = vector.load %arg3[%c0_5, %c128_6] : memref<8x512xf32, #tpu.memory_space<vmem>>, vector<8x128xf32>
    %9 = arith.subf %7, %8 : vector<8x128xf32>
    %10 = math.absf %9 : vector<8x128xf32>
    %c0_7 = arith.constant 0 : index
    %c256 = arith.constant 256 : index
    %11 = vector.load %arg2[%c0_7, %c256] : memref<8x512xf32, #tpu.memory_space<vmem>>, vector<8x128xf32>
    %c0_8 = arith.constant 0 : index
    %c256_9 = arith.constant 256 : index
    %12 = vector.load %arg3[%c0_8, %c256_9] : memref<8x512xf32, #tpu.memory_space<vmem>>, vector<8x128xf32>
    %13 = arith.subf %11, %12 : vector<8x128xf32>
    %14 = math.absf %13 : vector<8x128xf32>
    %c0_10 = arith.constant 0 : index
    %c384 = arith.constant 384 : index
    %15 = vector.load %arg2[%c0_10, %c384] : memref<8x512xf32, #tpu.memory_space<vmem>>, vector<8x128xf32>
    %c0_11 = arith.constant 0 : index
    %c384_12 = arith.constant 384 : index
    %16 = vector.load %arg3[%c0_11, %c384_12] : memref<8x512xf32, #tpu.memory_space<vmem>>, vector<8x128xf32>
    %17 = arith.subf %15, %16 : vector<8x128xf32>
    %18 = math.absf %17 : vector<8x128xf32>
    %19 = arith.addf %6, %10 : vector<8x128xf32>
    %20 = arith.addf %19, %14 : vector<8x128xf32>
    %21 = arith.addf %20, %18 : vector<8x128xf32>
    %c0_13 = arith.constant 0 : index
    %c0_14 = arith.constant 0 : index
    %22 = vector.load %arg5[%c0_13, %c0_14] : memref<8x128xf32, #tpu.memory_space<vmem>>, vector<8x128xf32>
    %23 = arith.addf %22, %21 : vector<8x128xf32>
    %c0_15 = arith.constant 0 : index
    %c0_16 = arith.constant 0 : index
    %24 = vector.load %arg5[%c0_15, %c0_16] : memref<8x128xf32, #tpu.memory_space<vmem>>, vector<8x128xf32>
    tpu.vector_store %arg5[%c0_15, %c0_16], %23 {strides = array<i32>} : memref<8x128xf32, #tpu.memory_space<vmem>>, vector<8x128xf32>,
    %c0_i32_17 = arith.constant 0 : i32
    %25 = arith.cmpi eq, %arg1, %c0_i32_17 : i32
    %26 = arith.extui %25 : i1 to i32
    %c0_i32_18 = arith.constant 0 : i32
    %27 = arith.cmpi ne, %26, %c0_i32_18 : i32
    scf.if %27 {
      %c0_19 = arith.constant 0 : index
      %c0_20 = arith.constant 0 : index
      %28 = vector.load %arg5[%c0_19, %c0_20] : memref<8x128xf32, #tpu.memory_space<vmem>>, vector<8x128xf32>
      %cst = arith.constant dense<0.000000e+00> : vector<8xf32>
      %29 = vector.multi_reduction <add>, %28, %cst [1] : vector<8x128xf32> to vector<8xf32>
      %30 = vector.shape_cast %29 : vector<8xf32> to vector<8x1xf32>
      %cst_21 = arith.constant 0.001953125 : f32
      %31 = vector.broadcast %cst_21 : f32 to vector<8x1xf32>
      %32 = arith.mulf %30, %31 : vector<8x1xf32>
      %c0_22 = arith.constant 0 : index
      %c0_23 = arith.constant 0 : index
      %33 = vector.load %arg4[%c0_22, %c0_23] : memref<8x1xf32, #tpu.memory_space<vmem>>, vector<8x1xf32>
      tpu.vector_store %arg4[%c0_22, %c0_23], %32 {strides = array<i32>} : memref<8x1xf32, #tpu.memory_space<vmem>>, vector<8x1xf32>,
    } else {
    }
    return
  }
  func.func @transform_0(%arg0: i32, %arg1: i32) -> (i32, i32) {
    %c0_i32 = arith.constant 0 : i32
    return %arg0, %arg1 : i32, i32
  }
  func.func @transform_1(%arg0: i32, %arg1: i32) -> (i32, i32) {
    %c0_i32 = arith.constant 0 : i32
    return %arg0, %arg1 : i32, i32
  }
  func.func @transform_2(%arg0: i32, %arg1: i32) -> (i32, i32) {
    %c0_i32 = arith.constant 0 : i32
    %c0_i32_0 = arith.constant 0 : i32
    return %arg0, %c0_i32 : i32, i32
  }
}

</mosaic_0001>

<bundles_post_ra>
// kernel: tpu_custom_call.1
= control target key start
LH: loop header
LB: loop body
LE: loop exit
PB: predicated region body
PF: predicated region fallthrough
CT: control target
= control target key end

     0   :  { %7 = vsyncpa [#allocation4], 0  ;;  %s149_s0 = inlined_call_operand.hbm [shape: f32[8,512], index: 0, kind: input, shape index: {}]   ;;  %s150_s1 = inlined_call_operand.hbm [shape: f32[8,512], index: 1, kind: input, shape index: {}]   ;;  %s151_s2 = inlined_call_operand.vmem [shape: f32[8,1], index: 2, kind: output, shape index: {}]  }
   0x1   :  { %8 = vsyncpa [#allocation6], 0  ;;  %s123_s9 = smov [#allocation3]   ;;  %s124_s11 = smov [#allocation5]  }
   0x2   :  { %s15_s10 = sshll.u32 %s123_s9, 4  ;;  %s25_s12 = sshll.u32 %s124_s11, 4  ;;  %s16_s10 = int_to_ptr.vmem [resolvable:$true] %s15_s10  ;;  %s26_s12 = int_to_ptr.vmem [resolvable:$true] %s25_s12 }
   0x3   :  { %s87_s13 = scalar_lea.vmem %s16_s10, 512  ;;  %p92_p1 = scmp.lt.s32.totalorder %s16_s10, %s16_s10 }
   0x4   :  { %p88_p0 = scmp.ne.s32.totalorder %s16_s10, %s87_s13  ;;  %p93_p2 = scmp.lt.s32.totalorder %s87_s13, %s87_s13 }
   0x6   :  { %p94_p3 = por %p93_p2, %p92_p1 }
   0x8   :  { %p95_p4 = pnand %p94_p3, %p88_p0 }
   0xa   :  { %98 = shalt.err (!%p95_p4)
}
   0xb   :  { %18 = dma.hbm_to_vmem [thread:$0]  %s149_s0, 512, %s16_s10, [#allocation4]  }
   0xc   :  { %s107_s16 = scalar_lea.vmem %s26_s12, 512  ;;  %p112_p6 = scmp.lt.s32.totalorder %s26_s12, %s26_s12 }
   0xd   :  { %p108_p5 = scmp.ne.s32.totalorder %s26_s12, %s107_s16  ;;  %p113_p7 = scmp.lt.s32.totalorder %s107_s16, %s107_s16 }
   0xf   :  { %p114_p8 = por %p113_p7, %p112_p6 }
  0x11   :  { %p115_p9 = pnand %p114_p8, %p108_p5 }
  0x13   :  { %118 = shalt.err (!%p115_p9)
}
  0x14   :  { %28 = dma.hbm_to_vmem [thread:$0]  %s150_s1, 512, %s26_s12, [#allocation6]  }
  0x15   :  { %119 = dma.done.wait [#allocation4], 512  }
  0x16   :  { %120 = vsyncadd [#allocation4], 4294966784 }
  0x17   :  { %121 = dma.done.wait [#allocation6], 512  }
  0x18   :  { %122 = vsyncadd [#allocation6], 4294966784  ;;  %v40_v0 = vld [vmem:[#allocation3] sm:$0xff]  ;;  %v44_v2 = vld [vmem:[#allocation3 + $0x8] sm:$0xff]  ;;  %vm69_vm0 = vcmask 7168  }
  0x19   :  { %v41_v1 = vld [vmem:[#allocation5] sm:$0xff]  ;;  %v45_v4 = vld [vmem:[#allocation5 + $0x8] sm:$0xff]  ;;  %v48_v5 = vld [vmem:[#allocation3 + $0x10] sm:$0xff] }
  0x1a   :  { %v42_v3 = vsub.f32 %v40_v0, %v41_v1  ;;  %v49_v6 = vld [vmem:[#allocation5 + $0x10] sm:$0xff]  ;;  %v46_v7 = vsub.f32 %v44_v2, %v45_v4  ;;  %v52_v9 = vld [vmem:[#allocation3 + $0x18] sm:$0xff] }
  0x1b   :  { %v50_v8 = vsub.f32 %v48_v5, %v49_v6  ;;  %v53_v10 = vld [vmem:[#allocation5 + $0x18] sm:$0xff] }
  0x1c   :  { %v43_v11 = vand.u32 2147483647, %v42_v3  ;;  %v54_v12 = vsub.f32 %v52_v9, %v53_v10  ;;  %v47_v13 = vand.u32 2147483647, %v46_v7 }
  0x1d   :  { %v51_v14 = vand.u32 2147483647, %v50_v8 }
  0x1e   :  { %v55_v15 = vand.u32 2147483647, %v54_v12  ;;  %v56_v16 = vadd.f32 %v47_v13, %v43_v11 }
  0x20   :  { %v57_v17 = vadd.f32 %v56_v16, %v51_v14 }
  0x22   :  { %v58_v18 = vadd.f32 %v57_v17, %v55_v15 }
  0x24   :  { %66 = vadd.xlane.f32.xlu0 %v58_v18 }
  0xad   :  { %v67_v19 = vpop.xlane.xlu0 %66 }
  0xae   :  { %v68_v20 = vmul.f32 0.001953125, %v67_v19 }
  0xb0   :  { %70 = vst.msk [vmem:[%s151_s2] sm:$0xff] %vm69_vm0, %v68_v20 }
  0xb1   :  { %75 = vsyncpa [#allocation4], 1 }
  0xb2   :  { %76 = vsyncpa [#allocation6], 1 }

</bundles_post_ra>
